<compile_context>
chip_gen: v6e
topology: v6e:2x2x1
jax: 0.10.0
libtpu: 0.0.40
codegen_flags: <defaults>
</compile_context>

<pallas_src>
import jax
import jax.numpy as jnp
from jax.experimental import pallas as pl
from jax.experimental.pallas import tpu as pltpu


def _make_kernel(g: int, W: int):
    """Kernel over lane-packed tiles: x tile is (row_tile, g*W)."""

    def kernel(x_ref, y_ref, ld_ref):
        x = x_ref[...]                              # (row_tile, g*W), lane-dense
        y_ref[...] = jnp.exp(x)                     # factorized_transform
        # get_log_det(x) == x elementwise; segmented sum over each W-wide
        # lane segment -> one column per packed logical row. Exact f32 adds.
        xf = x.astype(jnp.float32)
        sums = [
            jnp.sum(xf[:, k * W:(k + 1) * W], axis=-1, keepdims=True)
            for k in range(g)
        ]
        ld_ref[...] = sums[0] if g == 1 else jnp.concatenate(sums, axis=-1)

    return kernel


def factorized_transform_forward(x, *, target_block_bytes=2 << 20):
    """Forward pass of FactorizedTransform (dim=-1) with y = exp(x).

    Args:
      x: array of shape [B, C, H, W] (NCHW).
    Returns:
      y:        [B, C, H, W]  (= exp(x))
      log_det:  [B, C, H]     (= sum over W of per-element log-det = x)
    """
    B, C, H, W = x.shape
    N = B * C * H
    itemsize = jnp.dtype(x.dtype).itemsize

    # Lane-packing factor: g logical rows per packed row -> packed width g*W.
    if W < 128 and 128 % W == 0 and N % (128 // W) == 0:
        g = 128 // W
    else:
        g = 1                                        # fall back to unpacked rows
    Np = N // g
    Wp = g * W

    xp = x.reshape(Np, Wp)                           # free: row-major contiguous

    # Row tile: ~target_block_bytes of input per grid step, multiple of 8
    # sublanes, clamped to the (8-rounded) packed row count.
    rows_target = max(8, ((target_block_bytes // (Wp * itemsize)) // 8) * 8)
    np_ceil8 = ((Np + 7) // 8) * 8
    row_tile = int(min(rows_target, np_ceil8))

    # Pad to a whole number of blocks (zeros: exp(0)=1, log-det 0, sliced off).
    Np_pad = ((Np + row_tile - 1) // row_tile) * row_tile
    if Np_pad != Np:
        xp = jnp.pad(xp, ((0, Np_pad - Np), (0, 0)))
    grid = (Np_pad // row_tile,)

    # VMEM budget: double-buffered in/out blocks, capped for v7x (64 MiB phys).
    block_bytes = row_tile * Wp * itemsize
    ld_bytes = row_tile * g * 4
    need = 2 * (2 * block_bytes + ld_bytes)
    vmem_limit = int(min(max(2 * need, 32 << 20), 48 << 20))

    yp, ldp = pl.pallas_call(
        _make_kernel(g, W),
        out_shape=(
            jax.ShapeDtypeStruct((Np_pad, Wp), x.dtype),
            jax.ShapeDtypeStruct((Np_pad, g), jnp.float32),
        ),
        grid_spec=pltpu.PrefetchScalarGridSpec(
            num_scalar_prefetch=0,
            grid=grid,
            in_specs=[pl.BlockSpec((row_tile, Wp), lambda i: (i, 0))],
            out_specs=[
                pl.BlockSpec((row_tile, Wp), lambda i: (i, 0)),
                pl.BlockSpec((row_tile, g), lambda i: (i, 0)),
            ],
        ),
        compiler_params=pltpu.CompilerParams(
            dimension_semantics=("parallel",),
            vmem_limit_bytes=vmem_limit,
        ),
    )(xp)

    y = yp[:Np].reshape(B, C, H, W)
    log_det = ldp[:Np].reshape(B, C, H).astype(x.dtype)
    return y, log_det


def _reference(x):
    y = jnp.exp(x)
    log_det = jnp.sum(x, axis=-1)
    return y, log_det


if __name__ == "__main__":
    key = jax.random.PRNGKey(0)
    x = jax.random.normal(key, (2, 4, 16, 16), dtype=jnp.float32)

    y, log_det = factorized_transform_forward(x)
    jax.block_until_ready((y, log_det))

    y_ref, ld_ref = _reference(x)
    assert y.shape == (2, 4, 16, 16) and log_det.shape == (2, 4, 16)
    assert jnp.allclose(y, y_ref, atol=1e-5, rtol=1e-5)
    assert jnp.allclose(log_det, ld_ref, atol=1e-5, rtol=1e-5)

    print("KERNEL_OK")
</pallas_src>

<mosaic_0001>
module attributes {stable_mosaic.version = 11 : i64} {
  func.func @kernel(%arg0: i32, %arg1: memref<16x128xf32, #tpu.memory_space<vmem>>, %arg2: memref<16x128xf32, #tpu.memory_space<vmem>>, %arg3: memref<16x8xf32, #tpu.memory_space<vmem>>) attributes {dimension_semantics = [#tpu.dimension_semantics<parallel>], iteration_bounds = array<i64: 1>, scalar_prefetch = 0 : i64, scratch_operands = 0 : i64, tpu.core_type = #tpu.core_type<tc>, window_params = [{transform_indices = @transform_0, window_bounds = array<i64: 16, 128>}, {transform_indices = @transform_1, window_bounds = array<i64: 16, 128>}, {transform_indices = @transform_2, window_bounds = array<i64: 16, 8>}]} {
    %c0 = arith.constant 0 : index
    %c0_0 = arith.constant 0 : index
    %0 = vector.load %arg1[%c0, %c0_0] : memref<16x128xf32, #tpu.memory_space<vmem>>, vector<16x128xf32>
    %1 = math.exp %0 : vector<16x128xf32>
    %c0_1 = arith.constant 0 : index
    %c0_2 = arith.constant 0 : index
    %2 = vector.load %arg2[%c0_1, %c0_2] : memref<16x128xf32, #tpu.memory_space<vmem>>, vector<16x128xf32>
    tpu.vector_store %arg2[%c0_1, %c0_2], %1 {strides = array<i32>} : memref<16x128xf32, #tpu.memory_space<vmem>>, vector<16x128xf32>,
    %3 = vector.extract_strided_slice %0 {offsets = [0, 0], sizes = [16, 16], strides = [1, 1]} : vector<16x128xf32> to vector<16x16xf32>
    %cst = arith.constant dense<0.000000e+00> : vector<16xf32>
    %4 = vector.multi_reduction <add>, %3, %cst [1] : vector<16x16xf32> to vector<16xf32>
    %5 = vector.shape_cast %4 : vector<16xf32> to vector<16x1xf32>
    %6 = vector.extract_strided_slice %0 {offsets = [0, 16], sizes = [16, 16], strides = [1, 1]} : vector<16x128xf32> to vector<16x16xf32>
    %cst_3 = arith.constant dense<0.000000e+00> : vector<16xf32>
    %7 = vector.multi_reduction <add>, %6, %cst_3 [1] : vector<16x16xf32> to vector<16xf32>
    %8 = vector.shape_cast %7 : vector<16xf32> to vector<16x1xf32>
    %9 = vector.extract_strided_slice %0 {offsets = [0, 32], sizes = [16, 16], strides = [1, 1]} : vector<16x128xf32> to vector<16x16xf32>
    %cst_4 = arith.constant dense<0.000000e+00> : vector<16xf32>
    %10 = vector.multi_reduction <add>, %9, %cst_4 [1] : vector<16x16xf32> to vector<16xf32>
    %11 = vector.shape_cast %10 : vector<16xf32> to vector<16x1xf32>
    %12 = vector.extract_strided_slice %0 {offsets = [0, 48], sizes = [16, 16], strides = [1, 1]} : vector<16x128xf32> to vector<16x16xf32>
    %cst_5 = arith.constant dense<0.000000e+00> : vector<16xf32>
    %13 = vector.multi_reduction <add>, %12, %cst_5 [1] : vector<16x16xf32> to vector<16xf32>
    %14 = vector.shape_cast %13 : vector<16xf32> to vector<16x1xf32>
    %15 = vector.extract_strided_slice %0 {offsets = [0, 64], sizes = [16, 16], strides = [1, 1]} : vector<16x128xf32> to vector<16x16xf32>
    %cst_6 = arith.constant dense<0.000000e+00> : vector<16xf32>
    %16 = vector.multi_reduction <add>, %15, %cst_6 [1] : vector<16x16xf32> to vector<16xf32>
    %17 = vector.shape_cast %16 : vector<16xf32> to vector<16x1xf32>
    %18 = vector.extract_strided_slice %0 {offsets = [0, 80], sizes = [16, 16], strides = [1, 1]} : vector<16x128xf32> to vector<16x16xf32>
    %cst_7 = arith.constant dense<0.000000e+00> : vector<16xf32>
    %19 = vector.multi_reduction <add>, %18, %cst_7 [1] : vector<16x16xf32> to vector<16xf32>
    %20 = vector.shape_cast %19 : vector<16xf32> to vector<16x1xf32>
    %21 = vector.extract_strided_slice %0 {offsets = [0, 96], sizes = [16, 16], strides = [1, 1]} : vector<16x128xf32> to vector<16x16xf32>
    %cst_8 = arith.constant dense<0.000000e+00> : vector<16xf32>
    %22 = vector.multi_reduction <add>, %21, %cst_8 [1] : vector<16x16xf32> to vector<16xf32>
    %23 = vector.shape_cast %22 : vector<16xf32> to vector<16x1xf32>
    %24 = vector.extract_strided_slice %0 {offsets = [0, 112], sizes = [16, 16], strides = [1, 1]} : vector<16x128xf32> to vector<16x16xf32>
    %cst_9 = arith.constant dense<0.000000e+00> : vector<16xf32>
    %25 = vector.multi_reduction <add>, %24, %cst_9 [1] : vector<16x16xf32> to vector<16xf32>
    %26 = vector.shape_cast %25 : vector<16xf32> to vector<16x1xf32>
    %27 = tpu.concatenate %5, %8, %11, %14, %17, %20, %23, %26 in 1 : vector<16x1xf32>, vector<16x1xf32>, vector<16x1xf32>, vector<16x1xf32>, vector<16x1xf32>, vector<16x1xf32>, vector<16x1xf32>, vector<16x1xf32> -> vector<16x8xf32>
    %c0_10 = arith.constant 0 : index
    %c0_11 = arith.constant 0 : index
    %28 = vector.load %arg3[%c0_10, %c0_11] : memref<16x8xf32, #tpu.memory_space<vmem>>, vector<16x8xf32>
    tpu.vector_store %arg3[%c0_10, %c0_11], %27 {strides = array<i32>} : memref<16x8xf32, #tpu.memory_space<vmem>>, vector<16x8xf32>,
    return
  }
  func.func @transform_0(%arg0: i32) -> (i32, i32) {
    %c0_i32 = arith.constant 0 : i32
    %c0_i32_0 = arith.constant 0 : i32
    return %arg0, %c0_i32 : i32, i32
  }
  func.func @transform_1(%arg0: i32) -> (i32, i32) {
    %c0_i32 = arith.constant 0 : i32
    %c0_i32_0 = arith.constant 0 : i32
    return %arg0, %c0_i32 : i32, i32
  }
  func.func @transform_2(%arg0: i32) -> (i32, i32) {
    %c0_i32 = arith.constant 0 : i32
    %c0_i32_0 = arith.constant 0 : i32
    return %arg0, %c0_i32 : i32, i32
  }
}

</mosaic_0001>

<bundles_post_ra>
// kernel: tpu_custom_call.1
= control target key start
LH: loop header
LB: loop body
LE: loop exit
PB: predicated region body
PF: predicated region fallthrough
CT: control target
= control target key end

     0   :  { %8 = vsyncpa [#allocation3], 0  ;;  %s321_s0 = inlined_call_operand.hbm [shape: f32[16,128], index: 0, kind: input, shape index: {}]   ;;  %s322_s1 = inlined_call_operand.hbm [shape: f32[16,128], index: 1, kind: output, shape index: {0}]   ;;  %s323_s2 = inlined_call_operand.vmem [shape: f32[16,8], index: 2, kind: output, shape index: {1}]  }
   0x1   :  { %9 = vsyncpa [#allocation4], 0  ;;  %s230_s9 = smov [#allocation2]  }
   0x2   :  { %s15_s10 = sshll.u32 %s230_s9, 4  ;;  %s16_s10 = int_to_ptr.vmem [resolvable:$true] %s15_s10 }
   0x3   :  { %s194_s11 = scalar_lea.vmem %s16_s10, 256  ;;  %p199_p1 = scmp.lt.s32.totalorder %s16_s10, %s16_s10 }
   0x4   :  { %p195_p0 = scmp.ne.s32.totalorder %s16_s10, %s194_s11  ;;  %p200_p2 = scmp.lt.s32.totalorder %s194_s11, %s194_s11 }
   0x6   :  { %p201_p3 = por %p200_p2, %p199_p1 }
   0x8   :  { %p202_p4 = pnand %p201_p3, %p195_p0 }
   0xa   :  { %205 = shalt.err (!%p202_p4)
}
   0xb   :  { %s231_s12 = smov 128   ;;  %s232_s13 = smov 8  }
   0xc   :  { %21 = dma.hbm_to_vmem [thread:$0]  %s321_s0, 256, %s16_s10, [#allocation3], %s231_s12, %s231_s12, %s232_s13  }
   0xd   :  { %226 = dma.done.wait [#allocation3], 256  }
   0xe   :  { %227 = vsyncadd [#allocation3], 4294967040  ;;  %vm33_vm0 = vcmask 130048   ;;  %v262_v0 = vld [vmem:[#allocation2] sm:$0xff]  ;;  %v264_v1 = vld [vmem:[#allocation2 + $0x8] sm:$0xff]  ;;  %s233_s16 = smov 112  }
   0xf   :  { %42 = vrot.lane.b32.xlu1 %v262_v0, %s233_s16  ;;  %v34_v2 = vsel %vm33_vm0, %v262_v0, 0.0  ;;  %v37_v3 = vsel %vm33_vm0, %v264_v1, 0.0  ;;  %s234_s0 = smov 80   ;;  %s235_s17 = smov 64   ;;  %v27_v32 = vmul.f32 1.442695, %v262_v0 }
  0x10   :  { %35 = vadd.xlane.f32.xlu0 %v34_v2  ;;  %s236_s18 = smov 48   ;;  %s237_s19 = smov 96   ;;  %v29_v33 = vmul.f32 1.442695, %v264_v1 }
  0x11   :  { %s238_s20 = smov 32   ;;  %s239_s21 = smov 16   ;;  %182 = vpow2.f32 %v27_v32 }
  0x12   :  { %184 = vpow2.f32 %v29_v33  ;;  %s240_s22 = smov [#allocation5]  }
  0x13   :  { %44 = vrot.lane.b32.xlu1 %v264_v1, %s233_s16  ;;  %s155_s23 = sshll.u32 %s240_s22, 4  ;;  %s156_s23 = int_to_ptr.vmem [resolvable:$true] %s155_s23 }
  0x14   :  { %38 = vadd.xlane.f32.xlu0 %v37_v3  ;;  %s206_s24 = scalar_lea.vmem %s156_s23, 256  ;;  %p211_p6 = scmp.lt.s32.totalorder %s156_s23, %s156_s23 }
  0x15   :  { %p207_p5 = scmp.ne.s32.totalorder %s156_s23, %s206_s24  ;;  %p212_p7 = scmp.lt.s32.totalorder %s206_s24, %s206_s24 }
  0x17   :  { %66 = vrot.lane.b32.xlu1 %v262_v0, %s234_s0  ;;  %p213_p8 = por %p212_p7, %p211_p6 }
  0x19   :  { %p214_p9 = pnand %p213_p8, %p207_p5 }
  0x1b   :  { %68 = vrot.lane.b32.xlu1 %v264_v1, %s234_s0 }
  0x1e   :  { %v183_v36 = vpop.eup %182 }
  0x1f   :  { %78 = vrot.lane.b32.xlu1 %v262_v0, %s235_s17  ;;  %v185_v37 = vpop.eup %184  ;;  %31 = vst [vmem:[#allocation5] sm:$0xff] %v183_v36 }
  0x20   :  { %32 = vst [vmem:[#allocation5 + $0x8] sm:$0xff] %v185_v37 }
  0x23   :  { %90 = vrot.lane.b32.xlu1 %v262_v0, %s236_s18 }
  0x27   :  { %92 = vrot.lane.b32.xlu1 %v264_v1, %s236_s18 }
  0x2a   :  { %54 = vrot.lane.b32.xlu0 %v262_v0, %s237_s19 }
  0x2b   :  { %102 = vrot.lane.b32.xlu1 %v262_v0, %s238_s20 }
  0x2e   :  { %56 = vrot.lane.b32.xlu0 %v264_v1, %s237_s19 }
  0x2f   :  { %104 = vrot.lane.b32.xlu1 %v264_v1, %s238_s20 }
  0x32   :  { %80 = vrot.lane.b32.xlu0 %v264_v1, %s235_s17 }
  0x33   :  { %114 = vrot.lane.b32.xlu1 %v262_v0, %s239_s21 }
  0x37   :  { %116 = vrot.lane.b32.xlu1 %v264_v1, %s239_s21 }
  0x81   :  { %v43_v4 = vpop.permute.xlu1 %42 }
  0x82   :  { %v48_v5 = vsel %vm33_vm0, %v43_v4, 0.0 }
  0x83   :  { %49 = vadd.xlane.f32.xlu0 %v48_v5 }
  0x85   :  { %v45_v6 = vpop.permute.xlu1 %44 }
  0x86   :  { %v51_v7 = vsel %vm33_vm0, %v45_v6, 0.0 }
  0x87   :  { %52 = vadd.xlane.f32.xlu1 %v51_v7 }
  0x89   :  { %v67_v8 = vpop.permute.xlu1 %66 }
  0x8a   :  { %v72_v20 = vsel %vm33_vm0, %v67_v8, 0.0 }
  0x8d   :  { %v69_v9 = vpop.permute.xlu1 %68 }
  0x8e   :  { %v75_v23 = vsel %vm33_vm0, %v69_v9, 0.0 }
  0x91   :  { %v79_v10 = vpop.permute.xlu1 %78 }
  0x92   :  { %v84_v24 = vsel %vm33_vm0, %v79_v10, 0.0 }
  0x95   :  { %v91_v11 = vpop.permute.xlu1 %90 }
  0x96   :  { %v96_v30 = vsel %vm33_vm0, %v91_v11, 0.0 }
  0x99   :  { %v286_v12 = vpop.xlane.xlu0 %35  ;;  %v93_v13 = vpop.permute.xlu1 %92 }
  0x9a   :  { %v99_v27 = vsel %vm33_vm0, %v93_v13, 0.0 }
  0x9d   :  { %v39_v14 = vpop.xlane.xlu0 %38  ;;  %v103_v15 = vpop.permute.xlu1 %102 }
  0x9e   :  { %v108_v34 = vsel %vm33_vm0, %v103_v15, 0.0 }
  0xa1   :  { %v55_v16 = vpop.permute.xlu0 %54  ;;  %v105_v19 = vpop.permute.xlu1 %104 }
  0xa2   :  { %v60_v17 = vsel %vm33_vm0, %v55_v16, 0.0  ;;  %v111_v28 = vsel %vm33_vm0, %v105_v19, 0.0 }
  0xa3   :  { %61 = vadd.xlane.f32.xlu0 %v60_v17 }
  0xa5   :  { %v57_v18 = vpop.permute.xlu0 %56  ;;  %v115_v25 = vpop.permute.xlu1 %114 }
  0xa6   :  { %v63_v21 = vsel %vm33_vm0, %v57_v18, 0.0  ;;  %v120_v35 = vsel %vm33_vm0, %v115_v25, 0.0 }
  0xa7   :  { %73 = vadd.xlane.f32.xlu0 %v72_v20  ;;  %64 = vadd.xlane.f32.xlu1 %v63_v21 }
  0xa9   :  { %v81_v22 = vpop.permute.xlu0 %80  ;;  %v117_v29 = vpop.permute.xlu1 %116 }
  0xaa   :  { %v87_v26 = vsel %vm33_vm0, %v81_v22, 0.0  ;;  %v123_v31 = vsel %vm33_vm0, %v117_v29, 0.0 }
  0xab   :  { %76 = vadd.xlane.f32.xlu0 %v75_v23  ;;  %85 = vadd.xlane.f32.xlu1 %v84_v24 }
  0xaf   :  { %100 = vadd.xlane.f32.xlu1 %v99_v27  ;;  %88 = vadd.xlane.f32.xlu0 %v87_v26 }
  0xb3   :  { %112 = vadd.xlane.f32.xlu1 %v111_v28  ;;  %97 = vadd.xlane.f32.xlu0 %v96_v30 }
  0xb7   :  { %124 = vadd.xlane.f32.xlu1 %v123_v31  ;;  %109 = vadd.xlane.f32.xlu0 %v108_v34 }
  0xbb   :  { %121 = vadd.xlane.f32.xlu0 %v120_v35 }
  0xbc   :  { %217 = shalt.err (!%p214_p9)
}
  0xbd   :  { %161 = dma.vmem_to_hbm [thread:$0]  %s156_s23, 256, %s322_s1, [#allocation4], %s231_s12, %s231_s12, %s232_s13   ;;  %vm126_vm1 = vcmask 7168   ;;  %vm129_vm2 = vcmask 15360   ;;  %vm132_vm3 = vcmask 23552   ;;  %vm135_vm4 = vcmask 31744  }
  0xbe   :  { %vm138_vm5 = vcmask 39936   ;;  %vm141_vm6 = vcmask 48128   ;;  %vm144_vm7 = vcmask 56320   ;;  %vm147_vm8 = vcmask 64512  }
 0x10c   :  { %v50_v38 = vpop.xlane.xlu0 %49 }
 0x10d   :  { %v127_v53 = vsel %vm126_vm1, %v286_v12, %v50_v38 }
 0x110   :  { %v53_v39 = vpop.xlane.xlu1 %52 }
 0x111   :  { %v128_v47 = vsel %vm126_vm1, %v39_v14, %v53_v39 }
 0x12c   :  { %v62_v40 = vpop.xlane.xlu0 %61 }
 0x12d   :  { %v130_v55 = vsel %vm129_vm2, %v127_v53, %v62_v40 }
 0x130   :  { %v65_v41 = vpop.xlane.xlu1 %64  ;;  %v74_v42 = vpop.xlane.xlu0 %73 }
 0x131   :  { %v131_v48 = vsel %vm129_vm2, %v128_v47, %v65_v41  ;;  %v133_v59 = vsel %vm132_vm3, %v130_v55, %v74_v42 }
 0x134   :  { %v86_v43 = vpop.xlane.xlu1 %85  ;;  %v77_v44 = vpop.xlane.xlu0 %76 }
 0x135   :  { %v134_v49 = vsel %vm132_vm3, %v131_v48, %v77_v44  ;;  %v136_v61 = vsel %vm135_vm4, %v133_v59, %v86_v43 }
 0x138   :  { %v101_v45 = vpop.xlane.xlu1 %100  ;;  %v89_v46 = vpop.xlane.xlu0 %88 }
 0x139   :  { %v137_v50 = vsel %vm135_vm4, %v134_v49, %v89_v46 }
 0x13a   :  { %v140_v54 = vsel %vm138_vm5, %v137_v50, %v101_v45 }
 0x13c   :  { %v113_v51 = vpop.xlane.xlu1 %112  ;;  %v98_v52 = vpop.xlane.xlu0 %97 }
 0x13d   :  { %v143_v56 = vsel %vm141_vm6, %v140_v54, %v113_v51  ;;  %v139_v62 = vsel %vm138_vm5, %v136_v61, %v98_v52 }
 0x140   :  { %v125_v57 = vpop.xlane.xlu1 %124  ;;  %v110_v58 = vpop.xlane.xlu0 %109 }
 0x141   :  { %v146_v60 = vsel %vm144_vm7, %v143_v56, %v125_v57  ;;  %v142_v63 = vsel %vm141_vm6, %v139_v62, %v110_v58 }
 0x142   :  { %149 = vst.msk [vmem:[%s323_s2 + $0x8] sm:$0xff] %vm147_vm8, %v146_v60 }
 0x144   :  { %v122_v0 = vpop.xlane.xlu0 %121 }
 0x145   :  { %v145_v1 = vsel %vm144_vm7, %v142_v63, %v122_v0 }
 0x146   :  { %148 = vst.msk [vmem:[%s323_s2] sm:$0xff] %vm147_vm8, %v145_v1 }
 0x147   :  { %228 = dma.done.wait [#allocation4], 256  }
 0x148   :  { %229 = vsyncadd [#allocation4], 4294967040 }
 0x149   :  { %169 = vsyncpa [#allocation3], 1 }
 0x14a   :  { %170 = vsyncpa [#allocation4], 1 }

</bundles_post_ra>
